<compile_context>
chip_gen: v5e
topology: v5e:2x2
jax: 0.10.0
libtpu: 0.0.40
codegen_flags: <defaults>
</compile_context>

<pallas_src>
import math

import jax
import jax.numpy as jnp
from jax import lax
from jax.experimental import pallas as pl
from jax.experimental.pallas import tpu as pltpu


def _round_up(a, b):
    return (a + b - 1) // b * b


def _gelu_exact(x):
    # UNITER GELU: x * 0.5 * (1 + erf(x / sqrt(2)))  (exact, matches PyTorch)
    return x * 0.5 * (1.0 + lax.erf(x * jnp.float32(1.0 / math.sqrt(2.0))))


def region_feat_regression_kernel(
    x_ref,    # (TM, H)   input tokens (native dtype, straight to the MXU)
    w1_ref,   # (H, H)    dense weight, pre-transposed to (in, out)
    b1_ref,   # (1, H)    dense bias
    g_ref,    # (1, H)    LayerNorm gamma
    be_ref,   # (1, H)    LayerNorm beta
    w2_ref,   # (H, Fp)   img_linear_weight (feat dim padded to lane multiple)
    b2_ref,   # (1, Fp)   output bias (padded)
    o_ref,    # (TM, Fp)  output tile
):
    # Linear(H, H): native-dtype operands (bf16 stays bf16 on the MXU), f32 acc.
    h = jnp.dot(x_ref[...], w1_ref[...], preferred_element_type=jnp.float32)
    h = h + b1_ref[...].astype(jnp.float32)

    # GELU (exact erf form), f32.
    h = _gelu_exact(h)

    # LayerNorm over last dim, eps=1e-12.  One-pass sum / sum-of-squares so the
    # two cross-lane reductions are independent (no mean -> var serialization).
    inv_h = jnp.float32(1.0 / h.shape[-1])
    mean = jnp.sum(h, axis=-1, keepdims=True) * inv_h
    mean_sq = jnp.sum(h * h, axis=-1, keepdims=True) * inv_h
    var = jnp.maximum(mean_sq - mean * mean, 0.0)
    h = (h - mean) * lax.rsqrt(var + 1e-12)
    h = h * g_ref[...].astype(jnp.float32) + be_ref[...].astype(jnp.float32)

    # h @ img_linear_weight + bias.  Cast h to the weight dtype so a bf16
    # weight path gets a native bf16 x bf16 -> f32 MXU pass (no-op for f32).
    h = h.astype(w2_ref.dtype)
    out = jnp.dot(h, w2_ref[...], preferred_element_type=jnp.float32)
    out = out + b2_ref[...].astype(jnp.float32)

    o_ref[...] = out.astype(o_ref.dtype)


def prepare_params(params, weight_dtype=None):
    """One-time parameter prep (do NOT run per call):
      - transpose nn.Linear weight (out, in) -> (in, out),
      - pad feat dim up to a multiple of 128 (lane-dense output stores),
      - optionally down-cast weights (e.g. jnp.bfloat16) for native MXU passes.
    """
    w1, b1 = params["w1"], params["b1"]
    gamma, beta = params["gamma"], params["beta"]
    w_img, bias = params["w_img"], params["bias"]

    H = w1.shape[0]
    F = w_img.shape[-1]
    F_pad = _round_up(F, 128)

    if weight_dtype is not None:
        w1 = w1.astype(weight_dtype)
        w_img = w_img.astype(weight_dtype)

    if F_pad != F:
        w_img = jnp.pad(w_img, ((0, 0), (0, F_pad - F)))
        bias = jnp.pad(bias, (0, F_pad - F))

    return {
        "w1_t": jnp.transpose(w1),        # (H, H), in x out
        "b1": b1.reshape(1, H),
        "gamma": gamma.reshape(1, H),
        "beta": beta.reshape(1, H),
        "w_img": w_img,                   # (H, F_pad)
        "bias": bias.reshape(1, F_pad),
        "feat_dim": F,
    }


def _build_call(n_rows, hidden, f_pad, tile_m, out_dtype, single_buffer_weights,
                vmem_limit_bytes):
    def const_spec(shape):
        if single_buffer_weights:
            # Weight/bias blocks never change (constant index_map): one VMEM
            # buffer is enough — halves their resident footprint.
            return pl.BlockSpec(shape, lambda i: (0, 0),
                                pipeline_mode=pl.Buffered(1))
        return pl.BlockSpec(shape, lambda i: (0, 0))

    return pl.pallas_call(
        region_feat_regression_kernel,
        out_shape=jax.ShapeDtypeStruct((n_rows, f_pad), out_dtype),
        grid_spec=pltpu.PrefetchScalarGridSpec(
            num_scalar_prefetch=0,
            grid=(n_rows // tile_m,),
            in_specs=[
                pl.BlockSpec((tile_m, hidden), lambda i: (i, 0)),
                const_spec((hidden, hidden)),
                const_spec((1, hidden)),
                const_spec((1, hidden)),
                const_spec((1, hidden)),
                const_spec((hidden, f_pad)),
                const_spec((1, f_pad)),
            ],
            out_specs=pl.BlockSpec((tile_m, f_pad), lambda i: (i, 0)),
        ),
        compiler_params=pltpu.CompilerParams(
            dimension_semantics=("parallel",),   # row tiles shard across TCs
            vmem_limit_bytes=vmem_limit_bytes,
        ),
    )


def region_feature_regression(input_, prepared, *, tile_m=None):
    """input_: (..., H).  `prepared` comes from prepare_params().
    Returns (..., feat_dim) in input_'s dtype."""
    w1_t = prepared["w1_t"]
    H = w1_t.shape[0]
    F = prepared["feat_dim"]
    F_pad = prepared["w_img"].shape[-1]

    orig_shape = input_.shape
    x = input_.reshape(-1, H)
    N = x.shape[0]

    # Row tile: multiple of the sublane packing (8 f32 / 16 bf16); default 256
    # rows gives a multi-step grid (DMA/compute overlap, 2-TC sharding on v7x)
    # while staying well inside v7x's 64 MiB VMEM.
    sub = 16 if x.dtype == jnp.bfloat16 else 8
    if tile_m is None:
        tile_m = 256
    tile_m = max(sub, min(_round_up(tile_m, sub), _round_up(N, sub)))
    n_pad = _round_up(N, tile_m)
    if n_pad != N:
        x = jnp.pad(x, ((0, n_pad - N), (0, 0)))

    # Explicit scoped-VMEM budget with headroom (capped at v7x physical 64 MiB).
    w_bytes = (w1_t.size * w1_t.dtype.itemsize
               + prepared["w_img"].size * prepared["w_img"].dtype.itemsize
               + 3 * H * 4 + F_pad * 4)
    io_bytes = 2 * tile_m * (H + F_pad) * x.dtype.itemsize
    work_bytes = tile_m * (H + F_pad) * 4
    est = 2 * w_bytes + io_bytes + work_bytes      # worst case: dbl-buffered weights
    vmem_limit = int(min(64 * 2**20, max(32 * 2**20, 1.5 * est)))

    args = (x, w1_t, prepared["b1"], prepared["gamma"], prepared["beta"],
            prepared["w_img"], prepared["bias"])

    out = None
    for single_buf in (True, False):
        try:
            out = _build_call(n_pad, H, F_pad, tile_m, input_.dtype,
                              single_buf, vmem_limit)(*args)
            break
        except Exception:
            if not single_buf:
                raise   # even the default-buffered path failed: real error
            # pipeline_mode=pl.Buffered(1) not supported here; use defaults.

    out = out[:N, :F]
    return out.reshape(orig_shape[:-1] + (F,))


def _reference(input_, params):
    x = input_.astype(jnp.float32)
    h = x @ params["w1"].T.astype(jnp.float32) + params["b1"]
    h = _gelu_exact(h)
    mean = jnp.mean(h, axis=-1, keepdims=True)
    var = jnp.mean(jnp.square(h - mean), axis=-1, keepdims=True)
    h = (h - mean) / jnp.sqrt(var + 1e-12)
    h = h * params["gamma"] + params["beta"]
    return h @ params["w_img"].astype(jnp.float32) + params["bias"]


if __name__ == "__main__":
    # Small shapes: batch=2, seq=8, hidden=32, feat_dim=16
    B, S, H, FD = 2, 8, 32, 16
    key = jax.random.PRNGKey(0)
    k_x, k_w1, k_b1, k_wimg = jax.random.split(key, 4)

    input_ = jax.random.normal(k_x, (B, S, H), dtype=jnp.float32)

    params = {
        # nn.Linear(hidden, hidden): weight (out, in), bias (out,)
        "w1": jax.random.normal(k_w1, (H, H), dtype=jnp.float32) * (1.0 / math.sqrt(H)),
        "b1": jax.random.normal(k_b1, (H,), dtype=jnp.float32) * 0.02,
        # LayerNorm(hidden)
        "gamma": jnp.ones((H,), dtype=jnp.float32),
        "beta": jnp.zeros((H,), dtype=jnp.float32),
        # img_linear_weight: weight of nn.Linear(feat_dim, hidden) -> (hidden, feat_dim)
        "w_img": jax.random.normal(k_wimg, (H, FD), dtype=jnp.float32) * (1.0 / math.sqrt(FD)),
        # nn.Parameter(torch.zeros(feat_dim))
        "bias": jnp.zeros((FD,), dtype=jnp.float32),
    }

    prepared = prepare_params(params)   # one-time: transpose w1, pad feat dim
    out = region_feature_regression(input_, prepared)
    out = jax.block_until_ready(out)

    ref = _reference(input_, params)
    assert out.shape == (B, S, FD), out.shape
    max_err = float(jnp.max(jnp.abs(out - ref)))
    assert jnp.allclose(out, ref, atol=1e-4, rtol=1e-4), max_err

    print("KERNEL_OK")
</pallas_src>

<mosaic_0001>
module attributes {stable_mosaic.version = 11 : i64} {
  func.func @region_feat_regression_kernel(%arg0: i32, %arg1: memref<16x32xf32, #tpu.memory_space<vmem>>, %arg2: memref<32x32xf32, #tpu.memory_space<vmem>>, %arg3: memref<1x32xf32, #tpu.memory_space<vmem>>, %arg4: memref<1x32xf32, #tpu.memory_space<vmem>>, %arg5: memref<1x32xf32, #tpu.memory_space<vmem>>, %arg6: memref<32x128xf32, #tpu.memory_space<vmem>>, %arg7: memref<1x128xf32, #tpu.memory_space<vmem>>, %arg8: memref<16x128xf32, #tpu.memory_space<vmem>>) attributes {dimension_semantics = [#tpu.dimension_semantics<parallel>], iteration_bounds = array<i64: 1>, scalar_prefetch = 0 : i64, scratch_operands = 0 : i64, tpu.core_type = #tpu.core_type<tc>, window_params = [{transform_indices = @transform_0, window_bounds = array<i64: 16, 32>}, {pipeline_mode = #tpu.pipeline_mode<synchronous>, transform_indices = @transform_1, window_bounds = array<i64: 32, 32>}, {pipeline_mode = #tpu.pipeline_mode<synchronous>, transform_indices = @transform_2, window_bounds = array<i64: 1, 32>}, {pipeline_mode = #tpu.pipeline_mode<synchronous>, transform_indices = @transform_3, window_bounds = array<i64: 1, 32>}, {pipeline_mode = #tpu.pipeline_mode<synchronous>, transform_indices = @transform_4, window_bounds = array<i64: 1, 32>}, {pipeline_mode = #tpu.pipeline_mode<synchronous>, transform_indices = @transform_5, window_bounds = array<i64: 32, 128>}, {pipeline_mode = #tpu.pipeline_mode<synchronous>, transform_indices = @transform_6, window_bounds = array<i64: 1, 128>}, {transform_indices = @transform_7, window_bounds = array<i64: 16, 128>}]} {
    %c0 = arith.constant 0 : index
    %c0_0 = arith.constant 0 : index
    %0 = vector.load %arg1[%c0, %c0_0] : memref<16x32xf32, #tpu.memory_space<vmem>>, vector<16x32xf32>
    %c0_1 = arith.constant 0 : index
    %c0_2 = arith.constant 0 : index
    %1 = vector.load %arg2[%c0_1, %c0_2] : memref<32x32xf32, #tpu.memory_space<vmem>>, vector<32x32xf32>
    %cst = arith.constant dense<0.000000e+00> : vector<16x32xf32>
    %2 = tpu.matmul %0, %1, %cst {dimension_numbers = #tpu.dot_dimension_numbers<[1], [0], [0], [1], [0, 0, 1, 1], [], []>} : vector<16x32xf32>, vector<32x32xf32>, vector<16x32xf32> -> vector<16x32xf32>
    %c0_3 = arith.constant 0 : index
    %c0_4 = arith.constant 0 : index
    %3 = vector.load %arg3[%c0_3, %c0_4] : memref<1x32xf32, #tpu.memory_space<vmem>>, vector<1x32xf32>
    %4 = vector.broadcast %3 : vector<1x32xf32> to vector<16x32xf32>
    %5 = arith.addf %2, %4 : vector<16x32xf32>
    %cst_5 = arith.constant 5.000000e-01 : f32
    %6 = vector.broadcast %cst_5 : f32 to vector<16x32xf32>
    %7 = arith.mulf %5, %6 : vector<16x32xf32>
    %cst_6 = arith.constant 0.707106769 : f32
    %8 = vector.broadcast %cst_6 : f32 to vector<16x32xf32>
    %9 = arith.mulf %5, %8 : vector<16x32xf32>
    %10 = math.erf %9 : vector<16x32xf32>
    %cst_7 = arith.constant 1.000000e+00 : f32
    %11 = vector.broadcast %cst_7 : f32 to vector<16x32xf32>
    %12 = arith.addf %11, %10 : vector<16x32xf32>
    %13 = arith.mulf %7, %12 : vector<16x32xf32>
    %cst_8 = arith.constant dense<0.000000e+00> : vector<16xf32>
    %14 = vector.multi_reduction <add>, %13, %cst_8 [1] : vector<16x32xf32> to vector<16xf32>
    %15 = vector.shape_cast %14 : vector<16xf32> to vector<16x1xf32>
    %cst_9 = arith.constant 3.125000e-02 : f32
    %16 = vector.broadcast %cst_9 : f32 to vector<16x1xf32>
    %17 = arith.mulf %15, %16 : vector<16x1xf32>
    %18 = arith.mulf %13, %13 : vector<16x32xf32>
    %cst_10 = arith.constant dense<0.000000e+00> : vector<16xf32>
    %19 = vector.multi_reduction <add>, %18, %cst_10 [1] : vector<16x32xf32> to vector<16xf32>
    %20 = vector.shape_cast %19 : vector<16xf32> to vector<16x1xf32>
    %cst_11 = arith.constant 3.125000e-02 : f32
    %21 = vector.broadcast %cst_11 : f32 to vector<16x1xf32>
    %22 = arith.mulf %20, %21 : vector<16x1xf32>
    %23 = arith.mulf %17, %17 : vector<16x1xf32>
    %24 = arith.subf %22, %23 : vector<16x1xf32>
    %cst_12 = arith.constant 0.000000e+00 : f32
    %25 = vector.broadcast %cst_12 : f32 to vector<16x1xf32>
    %26 = arith.maximumf %24, %25 : vector<16x1xf32>
    %27 = vector.broadcast %17 : vector<16x1xf32> to vector<16x32xf32>
    %28 = arith.subf %13, %27 : vector<16x32xf32>
    %cst_13 = arith.constant 9.99999996E-13 : f32
    %29 = vector.broadcast %cst_13 : f32 to vector<16x1xf32>
    %30 = arith.addf %26, %29 : vector<16x1xf32>
    %31 = math.rsqrt %30 : vector<16x1xf32>
    %32 = vector.broadcast %31 : vector<16x1xf32> to vector<16x32xf32>
    %33 = arith.mulf %28, %32 : vector<16x32xf32>
    %c0_14 = arith.constant 0 : index
    %c0_15 = arith.constant 0 : index
    %34 = vector.load %arg4[%c0_14, %c0_15] : memref<1x32xf32, #tpu.memory_space<vmem>>, vector<1x32xf32>
    %35 = vector.broadcast %34 : vector<1x32xf32> to vector<16x32xf32>
    %36 = arith.mulf %33, %35 : vector<16x32xf32>
    %c0_16 = arith.constant 0 : index
    %c0_17 = arith.constant 0 : index
    %37 = vector.load %arg5[%c0_16, %c0_17] : memref<1x32xf32, #tpu.memory_space<vmem>>, vector<1x32xf32>
    %38 = vector.broadcast %37 : vector<1x32xf32> to vector<16x32xf32>
    %39 = arith.addf %36, %38 : vector<16x32xf32>
    %c0_18 = arith.constant 0 : index
    %c0_19 = arith.constant 0 : index
    %40 = vector.load %arg6[%c0_18, %c0_19] : memref<32x128xf32, #tpu.memory_space<vmem>>, vector<32x128xf32>
    %cst_20 = arith.constant dense<0.000000e+00> : vector<16x128xf32>
    %41 = tpu.matmul %39, %40, %cst_20 {dimension_numbers = #tpu.dot_dimension_numbers<[1], [0], [0], [1], [0, 0, 1, 1], [], []>} : vector<16x32xf32>, vector<32x128xf32>, vector<16x128xf32> -> vector<16x128xf32>
    %c0_21 = arith.constant 0 : index
    %c0_22 = arith.constant 0 : index
    %42 = vector.load %arg7[%c0_21, %c0_22] : memref<1x128xf32, #tpu.memory_space<vmem>>, vector<1x128xf32>
    %43 = vector.broadcast %42 : vector<1x128xf32> to vector<16x128xf32>
    %44 = arith.addf %41, %43 : vector<16x128xf32>
    %c0_23 = arith.constant 0 : index
    %c0_24 = arith.constant 0 : index
    %45 = vector.load %arg8[%c0_23, %c0_24] : memref<16x128xf32, #tpu.memory_space<vmem>>, vector<16x128xf32>
    tpu.vector_store %arg8[%c0_23, %c0_24], %44 {strides = array<i32>} : memref<16x128xf32, #tpu.memory_space<vmem>>, vector<16x128xf32>,
    return
  }
  func.func @transform_0(%arg0: i32) -> (i32, i32) {
    %c0_i32 = arith.constant 0 : i32
    %c0_i32_0 = arith.constant 0 : i32
    return %arg0, %c0_i32 : i32, i32
  }
  func.func @transform_1(%arg0: i32) -> (i32, i32) {
    %c0_i32 = arith.constant 0 : i32
    %c0_i32_0 = arith.constant 0 : i32
    %c0_i32_1 = arith.constant 0 : i32
    return %c0_i32, %c0_i32_0 : i32, i32
  }
  func.func @transform_2(%arg0: i32) -> (i32, i32) {
    %c0_i32 = arith.constant 0 : i32
    %c0_i32_0 = arith.constant 0 : i32
    %c0_i32_1 = arith.constant 0 : i32
    return %c0_i32, %c0_i32_0 : i32, i32
  }
  func.func @transform_3(%arg0: i32) -> (i32, i32) {
    %c0_i32 = arith.constant 0 : i32
    %c0_i32_0 = arith.constant 0 : i32
    %c0_i32_1 = arith.constant 0 : i32
    return %c0_i32, %c0_i32_0 : i32, i32
  }
  func.func @transform_4(%arg0: i32) -> (i32, i32) {
    %c0_i32 = arith.constant 0 : i32
    %c0_i32_0 = arith.constant 0 : i32
    %c0_i32_1 = arith.constant 0 : i32
    return %c0_i32, %c0_i32_0 : i32, i32
  }
  func.func @transform_5(%arg0: i32) -> (i32, i32) {
    %c0_i32 = arith.constant 0 : i32
    %c0_i32_0 = arith.constant 0 : i32
    %c0_i32_1 = arith.constant 0 : i32
    return %c0_i32, %c0_i32_0 : i32, i32
  }
  func.func @transform_6(%arg0: i32) -> (i32, i32) {
    %c0_i32 = arith.constant 0 : i32
    %c0_i32_0 = arith.constant 0 : i32
    %c0_i32_1 = arith.constant 0 : i32
    return %c0_i32, %c0_i32_0 : i32, i32
  }
  func.func @transform_7(%arg0: i32) -> (i32, i32) {
    %c0_i32 = arith.constant 0 : i32
    %c0_i32_0 = arith.constant 0 : i32
    return %arg0, %c0_i32 : i32, i32
  }
}

module attributes {stable_mosaic.version = 11 : i64} {
  func.func @region_feat_regression_kernel(%arg0: i32, %arg1: memref<16x32xf32, #tpu.memory_space<vmem>>, %arg2: memref<32x32xf32, #tpu.memory_space<vmem>>, %arg3: memref<1x32xf32, #tpu.memory_space<vmem>>, %arg4: memref<1x32xf32, #tpu.memory_space<vmem>>, %arg5: memref<1x32xf32, #tpu.memory_space<vmem>>, %arg6: memref<32x128xf32, #tpu.memory_space<vmem>>, %arg7: memref<1x128xf32, #tpu.memory_space<vmem>>, %arg8: memref<16x128xf32, #tpu.memory_space<vmem>>) attributes {dimension_semantics = [#tpu.dimension_semantics<parallel>], iteration_bounds = array<i64: 1>, scalar_prefetch = 0 : i64, scratch_operands = 0 : i64, tpu.core_type = #tpu.core_type<tc>, window_params = [{transform_indices = @transform_0, window_bounds = array<i64: 16, 32>}, {pipeline_mode = #tpu.pipeline_mode<synchronous>, transform_indices = @transform_1, window_bounds = array<i64: 32, 32>}, {pipeline_mode = #tpu.pipeline_mode<synchronous>, transform_indices = @transform_2, window_bounds = array<i64: 1, 32>}, {pipeline_mode = #tpu.pipeline_mode<synchronous>, transform_indices = @transform_3, window_bounds = array<i64: 1, 32>}, {pipeline_mode = #tpu.pipeline_mode<synchronous>, transform_indices = @transform_4, window_bounds = array<i64: 1, 32>}, {pipeline_mode = #tpu.pipeline_mode<synchronous>, transform_indices = @transform_5, window_bounds = array<i64: 32, 128>}, {pipeline_mode = #tpu.pipeline_mode<synchronous>, transform_indices = @transform_6, window_bounds = array<i64: 1, 128>}, {transform_indices = @transform_7, window_bounds = array<i64: 16, 128>}]} {
    %c0 = arith.constant 0 : index
    %c0_0 = arith.constant 0 : index
    %0 = vector.load %arg1[%c0, %c0_0] : memref<16x32xf32, #tpu.memory_space<vmem>>, vector<16x32xf32>
    %c0_1 = arith.constant 0 : index
    %c0_2 = arith.constant 0 : index
    %1 = vector.load %arg2[%c0_1, %c0_2] : memref<32x32xf32, #tpu.memory_space<vmem>>, vector<32x32xf32>
    %cst = arith.constant dense<0.000000e+00> : vector<16x32xf32>
    %2 = tpu.matmul %0, %1, %cst {dimension_numbers = #tpu.dot_dimension_numbers<[1], [0], [0], [1], [0, 0, 1, 1], [], []>} : vector<16x32xf32>, vector<32x32xf32>, vector<16x32xf32> -> vector<16x32xf32>
    %c0_3 = arith.constant 0 : index
    %c0_4 = arith.constant 0 : index
    %3 = vector.load %arg3[%c0_3, %c0_4] : memref<1x32xf32, #tpu.memory_space<vmem>>, vector<1x32xf32>
    %4 = vector.broadcast %3 : vector<1x32xf32> to vector<16x32xf32>
    %5 = arith.addf %2, %4 : vector<16x32xf32>
    %cst_5 = arith.constant 5.000000e-01 : f32
    %6 = vector.broadcast %cst_5 : f32 to vector<16x32xf32>
    %7 = arith.mulf %5, %6 : vector<16x32xf32>
    %cst_6 = arith.constant 0.707106769 : f32
    %8 = vector.broadcast %cst_6 : f32 to vector<16x32xf32>
    %9 = arith.mulf %5, %8 : vector<16x32xf32>
    %10 = math.erf %9 : vector<16x32xf32>
    %cst_7 = arith.constant 1.000000e+00 : f32
    %11 = vector.broadcast %cst_7 : f32 to vector<16x32xf32>
    %12 = arith.addf %11, %10 : vector<16x32xf32>
    %13 = arith.mulf %7, %12 : vector<16x32xf32>
    %cst_8 = arith.constant dense<0.000000e+00> : vector<16xf32>
    %14 = vector.multi_reduction <add>, %13, %cst_8 [1] : vector<16x32xf32> to vector<16xf32>
    %15 = vector.shape_cast %14 : vector<16xf32> to vector<16x1xf32>
    %cst_9 = arith.constant 3.125000e-02 : f32
    %16 = vector.broadcast %cst_9 : f32 to vector<16x1xf32>
    %17 = arith.mulf %15, %16 : vector<16x1xf32>
    %18 = arith.mulf %13, %13 : vector<16x32xf32>
    %cst_10 = arith.constant dense<0.000000e+00> : vector<16xf32>
    %19 = vector.multi_reduction <add>, %18, %cst_10 [1] : vector<16x32xf32> to vector<16xf32>
    %20 = vector.shape_cast %19 : vector<16xf32> to vector<16x1xf32>
    %cst_11 = arith.constant 3.125000e-02 : f32
    %21 = vector.broadcast %cst_11 : f32 to vector<16x1xf32>
    %22 = arith.mulf %20, %21 : vector<16x1xf32>
    %23 = arith.mulf %17, %17 : vector<16x1xf32>
    %24 = arith.subf %22, %23 : vector<16x1xf32>
    %cst_12 = arith.constant 0.000000e+00 : f32
    %25 = vector.broadcast %cst_12 : f32 to vector<16x1xf32>
    %26 = arith.maximumf %24, %25 : vector<16x1xf32>
    %27 = vector.broadcast %17 : vector<16x1xf32> to vector<16x32xf32>
    %28 = arith.subf %13, %27 : vector<16x32xf32>
    %cst_13 = arith.constant 9.99999996E-13 : f32
    %29 = vector.broadcast %cst_13 : f32 to vector<16x1xf32>
    %30 = arith.addf %26, %29 : vector<16x1xf32>
    %31 = math.rsqrt %30 : vector<16x1xf32>
    %32 = vector.broadcast %31 : vector<16x1xf32> to vector<16x32xf32>
    %33 = arith.mulf %28, %32 : vector<16x32xf32>
    %c0_14 = arith.constant 0 : index
    %c0_15 = arith.constant 0 : index
    %34 = vector.load %arg4[%c0_14, %c0_15] : memref<1x32xf32, #tpu.memory_space<vmem>>, vector<1x32xf32>
    %35 = vector.broadcast %34 : vector<1x32xf32> to vector<16x32xf32>
    %36 = arith.mulf %33, %35 : vector<16x32xf32>
    %c0_16 = arith.constant 0 : index
    %c0_17 = arith.constant 0 : index
    %37 = vector.load %arg5[%c0_16, %c0_17] : memref<1x32xf32, #tpu.memory_space<vmem>>, vector<1x32xf32>
    %38 = vector.broadcast %37 : vector<1x32xf32> to vector<16x32xf32>
    %39 = arith.addf %36, %38 : vector<16x32xf32>
    %c0_18 = arith.constant 0 : index
    %c0_19 = arith.constant 0 : index
    %40 = vector.load %arg6[%c0_18, %c0_19] : memref<32x128xf32, #tpu.memory_space<vmem>>, vector<32x128xf32>
    %cst_20 = arith.constant dense<0.000000e+00> : vector<16x128xf32>
    %41 = tpu.matmul %39, %40, %cst_20 {dimension_numbers = #tpu.dot_dimension_numbers<[1], [0], [0], [1], [0, 0, 1, 1], [], []>} : vector<16x32xf32>, vector<32x128xf32>, vector<16x128xf32> -> vector<16x128xf32>
    %c0_21 = arith.constant 0 : index
    %c0_22 = arith.constant 0 : index
    %42 = vector.load %arg7[%c0_21, %c0_22] : memref<1x128xf32, #tpu.memory_space<vmem>>, vector<1x128xf32>
    %43 = vector.broadcast %42 : vector<1x128xf32> to vector<16x128xf32>
    %44 = arith.addf %41, %43 : vector<16x128xf32>
    %c0_23 = arith.constant 0 : index
    %c0_24 = arith.constant 0 : index
    %45 = vector.load %arg8[%c0_23, %c0_24] : memref<16x128xf32, #tpu.memory_space<vmem>>, vector<16x128xf32>
    tpu.vector_store %arg8[%c0_23, %c0_24], %44 {strides = array<i32>} : memref<16x128xf32, #tpu.memory_space<vmem>>, vector<16x128xf32>,
    return
  }
  func.func @transform_0(%arg0: i32) -> (i32, i32) {
    %c0_i32 = arith.constant 0 : i32
    %c0_i32_0 = arith.constant 0 : i32
    return %arg0, %c0_i32 : i32, i32
  }
  func.func @transform_1(%arg0: i32) -> (i32, i32) {
    %c0_i32 = arith.constant 0 : i32
    %c0_i32_0 = arith.constant 0 : i32
    %c0_i32_1 = arith.constant 0 : i32
    return %c0_i32, %c0_i32_0 : i32, i32
  }
  func.func @transform_2(%arg0: i32) -> (i32, i32) {
    %c0_i32 = arith.constant 0 : i32
    %c0_i32_0 = arith.constant 0 : i32
    %c0_i32_1 = arith.constant 0 : i32
    return %c0_i32, %c0_i32_0 : i32, i32
  }
  func.func @transform_3(%arg0: i32) -> (i32, i32) {
    %c0_i32 = arith.constant 0 : i32
    %c0_i32_0 = arith.constant 0 : i32
    %c0_i32_1 = arith.constant 0 : i32
    return %c0_i32, %c0_i32_0 : i32, i32
  }
  func.func @transform_4(%arg0: i32) -> (i32, i32) {
    %c0_i32 = arith.constant 0 : i32
    %c0_i32_0 = arith.constant 0 : i32
    %c0_i32_1 = arith.constant 0 : i32
    return %c0_i32, %c0_i32_0 : i32, i32
  }
  func.func @transform_5(%arg0: i32) -> (i32, i32) {
    %c0_i32 = arith.constant 0 : i32
    %c0_i32_0 = arith.constant 0 : i32
    %c0_i32_1 = arith.constant 0 : i32
    return %c0_i32, %c0_i32_0 : i32, i32
  }
  func.func @transform_6(%arg0: i32) -> (i32, i32) {
    %c0_i32 = arith.constant 0 : i32
    %c0_i32_0 = arith.constant 0 : i32
    %c0_i32_1 = arith.constant 0 : i32
    return %c0_i32, %c0_i32_0 : i32, i32
  }
  func.func @transform_7(%arg0: i32) -> (i32, i32) {
    %c0_i32 = arith.constant 0 : i32
    %c0_i32_0 = arith.constant 0 : i32
    return %arg0, %c0_i32 : i32, i32
  }
}

</mosaic_0001>

<bundles_post_ra>
// kernel: tpu_custom_call.1
= control target key start
LH: loop header
LB: loop body
LE: loop exit
PB: predicated region body
PF: predicated region fallthrough
CT: control target
= control target key end

     0   :  { %12 = vsyncpa [#allocation3], 0  ;;  %s572_s0 = inlined_call_operand.hbm [shape: f32[16,32], index: 0, kind: input, shape index: {}]   ;;  %s573_s1 = inlined_call_operand.hbm [shape: f32[32,32], index: 1, kind: input, shape index: {}]   ;;  %s574_s2 = inlined_call_operand.vmem [shape: f32[1,32], index: 2, kind: input, shape index: {}]   ;;  %s575_s3 = inlined_call_operand.vmem [shape: f32[1,32], index: 3, kind: input, shape index: {}]   ;;  %s576_s4 = inlined_call_operand.vmem [shape: f32[1,32], index: 4, kind: input, shape index: {}]   ;;  %s577_s5 = inlined_call_operand.hbm [shape: f32[32,128], index: 5, kind: input, shape index: {}]   ;;  %s578_s6 = inlined_call_operand.vmem [shape: f32[1,128], index: 6, kind: input, shape index: {}]   ;;  %s579_s7 = inlined_call_operand.hbm [shape: f32[16,128], index: 7, kind: output, shape index: {}]  }
   0x1   :  { %13 = vsyncpa [#allocation6], 0 }
   0x2   :  { %14 = vsyncpa [#allocation4], 0  ;;  %s32_s26 = sshll.u32 %s573_s1, 4  ;;  %s457_s27 = smov [#allocation5]   ;;  %s33_s26 = int_to_ptr.hbm [resolvable:$true] %s32_s26 }
   0x3   :  { %s34_s28 = sshll.u32 %s457_s27, 4  ;;  %s19_s8 = sshll.u32 %s572_s0, 4  ;;  %s35_s28 = int_to_ptr.vmem [resolvable:$true] %s34_s28  ;;  %s20_s8 = int_to_ptr.hbm [resolvable:$true] %s19_s8 }
   0x4   :  { %s458_s9 = smov 128   ;;  %s459_s10 = smov 8  }
   0x5   :  { %40 = dma.hbm_to_vmem [thread:$0]  %s33_s26, 512, %s35_s28, [#allocation6], %s458_s9, %s458_s9, %s459_s10  }
   0x6   :  { %s460_s11 = smov [#allocation2]   ;;  %s51_s1 = sshll.u32 %s577_s5, 4  ;;  %s52_s1 = int_to_ptr.hbm [resolvable:$true] %s51_s1 }
   0x7   :  { %s21_s12 = sshll.u32 %s460_s11, 4  ;;  %s461_s0 = smov [#allocation7]   ;;  %s22_s12 = int_to_ptr.vmem [resolvable:$true] %s21_s12 }
   0x8   :  { %27 = dma.hbm_to_vmem [thread:$0]  %s20_s8, 256, %s22_s12, [#allocation3], %s458_s9, %s458_s9, %s459_s10  }
   0x9   :  { %s53_s15 = sshll.u32 %s461_s0, 4  ;;  %s54_s15 = int_to_ptr.vmem [resolvable:$true] %s53_s15 }
   0xa   :  { %59 = dma.hbm_to_vmem [thread:$0]  %s52_s1, 512, %s54_s15, [#allocation6], %s458_s9, %s458_s9, %s459_s10  }
   0xb   :  { %451 = dma.done.wait [#allocation3], 256  }
   0xc   :  { %452 = vsyncadd [#allocation3], 4294967040 }
   0xd   :  { %453 = dma.done.wait [#allocation6], 1024  }
   0xe   :  { %454 = vsyncadd [#allocation6], 4294966272  ;;  %v79_v0 = vld [vmem:[#allocation5 + $0x18] sm:$0xff]  ;;  %v78_v1 = vld [vmem:[#allocation5 + $0x10] sm:$0xff]  ;;  %vm84_vm0 = vcmask 261120   ;;  %s309_s24 = sshll.u32 %s579_s7, 4  ;;  %s310_s24 = int_to_ptr.hbm [resolvable:$true] %s309_s24 }
   0xf   :  { %103 = vmatpush.msra.mxu0 %v79_v0  ;;  %329 = vmatpush.msra.mxu2 %v79_v0  ;;  %v77_v2 = vld [vmem:[#allocation5 + $0x8] sm:$0xff]  ;;  %v76_v3 = vld [vmem:[#allocation5] sm:$0xff]  ;;  %v74_v4 = vld [vmem:[#allocation2] sm:$0xff] }
  0x10   :  { %v75_v5 = vld [vmem:[#allocation2 + $0x8] sm:$0xff]  ;;  %v343_v6 = vld [vmem:[%s574_s2] ss:$0 sm:$0xff] }
  0x11   :  { %104 = vmatpush.msra.mxu0 %v78_v1  ;;  %330 = vmatpush.msra.mxu2 %v78_v1 }
  0x13   :  { %105 = vmatpush.msra.mxu0 %v77_v2  ;;  %331 = vmatpush.msra.mxu2 %v77_v2 }
  0x15   :  { %106 = vmatpush.msra.mxu0 %v76_v3  ;;  %332 = vmatpush.msra.mxu2 %v76_v3 }
  0x16   :  { %323 = vmatmul.msk.f32.vlgmr.msra.gmra.mxu0 %vm84_vm0, %v74_v4  ;;  %324 = vmatmul.msk.f32.vlgmr.msra.gmra.mxu2 %vm84_vm0, %v75_v5 }
  0x93   :  { %v108_v7 = vpop.f32.mrf.mxu0 }
  0x94   :  { %v526_v8 = vadd.f32 %v343_v6, %v108_v7 }
  0x96   :  { %v116_v9 = vmul.f32 0.70710677, %v526_v8 }
  0x98   :  { %v118_v10 = vmul.f32 %v116_v9, %v116_v9 }
  0x99   :  { %v111_v11 = vpop.f32.mrf.mxu2 }
  0x9a   :  { %v119_v12 = vmin.f32 %v118_v10, 16.0  ;;  %v529_v13 = vadd.f32 %v343_v6, %v111_v11 }
  0x9c   :  { %v120_v14 = vmul.f32 2.1237322e-06, %v119_v12  ;;  %v131_v15 = vmul.f32 3.8918573e-05, %v119_v12  ;;  %v532_v16 = vmul.f32 0.70710677, %v529_v13 }
  0x9e   :  { %v121_v17 = vadd.f32 0.00028619796, %v120_v14  ;;  %v132_v18 = vadd.f32 0.001143296, %v131_v15  ;;  %v158_v19 = vmul.f32 %v532_v16, %v532_v16 }
  0xa0   :  { %v122_v20 = vmul.f32 %v121_v17, %v119_v12  ;;  %v133_v21 = vmul.f32 %v132_v18, %v119_v12  ;;  %v159_v22 = vmin.f32 %v158_v19, 16.0  ;;  %v114_v17 = vmul.f32 0.5, %v526_v8 }
  0xa2   :  { %v134_v23 = vadd.f32 0.014752088, %v133_v21  ;;  %v123_v24 = vadd.f32 0.0036580483, %v122_v20  ;;  %v160_v25 = vmul.f32 2.1237322e-06, %v159_v22 }
  0xa3   :  { %v171_v26 = vmul.f32 3.8918573e-05, %v159_v22 }
  0xa4   :  { %v135_v27 = vmul.f32 %v134_v23, %v119_v12  ;;  %v161_v28 = vadd.f32 0.00028619796, %v160_v25  ;;  %v124_v31 = vmul.f32 %v123_v24, %v119_v12 }
  0xa5   :  { %v172_v29 = vadd.f32 0.001143296, %v171_v26  ;;  %v115_v26 = vmul.f32 0.5, %v529_v13 }
  0xa6   :  { %v136_v30 = vadd.f32 0.112945676, %v135_v27  ;;  %v162_v32 = vmul.f32 %v161_v28, %v159_v22  ;;  %v125_v38 = vadd.f32 0.05243302, %v124_v31 }
  0xa7   :  { %v173_v33 = vmul.f32 %v172_v29, %v159_v22 }
  0xa8   :  { %v137_v34 = vmul.f32 %v136_v30, %v119_v12  ;;  %v163_v37 = vadd.f32 0.0036580483, %v162_v32  ;;  %v126_v44 = vmul.f32 %v125_v38, %v119_v12  ;;  %v267_v32 = vld [vmem:[#allocation7 + $0x18] sm:$0xff] }
  0xa9   :  { %v174_v35 = vadd.f32 0.014752088, %v173_v33  ;;  %290 = vmatpush.msra.mxu1 %v267_v32  ;;  %333 = vmatpush.msra.mxu3 %v267_v32 }
  0xaa   :  { %v138_v36 = vadd.f32 0.4994258, %v137_v34  ;;  %v164_v43 = vmul.f32 %v163_v37, %v159_v22  ;;  %v127_v48 = vadd.f32 0.18741608, %v126_v44  ;;  %v266_v34 = vld [vmem:[#allocation7 + $0x10] sm:$0xff]  ;;  %v264_v37 = vld [vmem:[#allocation7] sm:$0xff] }
  0xab   :  { %v175_v39 = vmul.f32 %v174_v35, %v159_v22  ;;  %291 = vmatpush.msra.mxu1 %v266_v34  ;;  %334 = vmatpush.msra.mxu3 %v266_v34 }
  0xac   :  { %v139_v40 = vmul.f32 %v138_v36, %v119_v12  ;;  %v165_v47 = vadd.f32 0.05243302, %v164_v43  ;;  %v128_v53 = vmul.f32 %v127_v48, %v119_v12  ;;  %v265_v36 = vld [vmem:[#allocation7 + $0x8] sm:$0xff] }
  0xad   :  { %v176_v41 = vadd.f32 0.112945676, %v175_v39  ;;  %292 = vmatpush.msra.mxu1 %v265_v36  ;;  %335 = vmatpush.msra.mxu3 %v265_v36 }
  0xae   :  { %v140_v42 = vadd.f32 1.0, %v139_v40  ;;  %v166_v52 = vmul.f32 %v165_v47, %v159_v22  ;;  %v129_v58 = vadd.f32 1.1283791, %v128_v53 }
  0xaf   :  { %v177_v45 = vmul.f32 %v176_v41, %v159_v22  ;;  %293 = vmatpush.msra.mxu1 %v264_v37  ;;  %336 = vmatpush.msra.mxu3 %v264_v37 }
  0xb0   :  { %347 = vrcp.f32 %v140_v42  ;;  %v152_v56 = vand.u32 2147483648, %v140_v42  ;;  %v167_v57 = vadd.f32 0.18741608, %v166_v52  ;;  %v150_v60 = vand.u32 2147483647, %v140_v42 }
  0xb1   :  { %v178_v46 = vadd.f32 0.4994258, %v177_v45  ;;  %vm146_vm2 = vweird.f32 %v140_v42  ;;  %v130_v2 = vmul.f32 %v129_v58, %v116_v9 }
  0xb2   :  { %v153_v63 = vor.u32 1.1754944e-38, %v152_v56  ;;  %v168_v0 = vmul.f32 %v167_v57, %v159_v22  ;;  %vm151_vm4 = vcmp.eq.f32.partialorder %v150_v60, 8.507059e+37 }
  0xb3   :  { %v179_v49 = vmul.f32 %v178_v46, %v159_v22 }
  0xb4   :  { %v169_v10 = vadd.f32 1.1283791, %v168_v0 }
  0xb5   :  { %v180_v50 = vadd.f32 1.0, %v179_v49 }
  0xb6   :  { %v348_v51 = vpop.eup %347  ;;  %v170_v9 = vmul.f32 %v169_v10, %v532_v16 }
  0xb7   :  { %v142_v54 = vmul.f32 %v348_v51, %v140_v42  ;;  %349 = vrcp.f32 %v180_v50  ;;  %vm147_vm1 = vweird.f32 %v348_v51  ;;  %v192_v7 = vand.u32 2147483648, %v180_v50 }
  0xb8   :  { %vm148_vm3 = vmor %vm146_vm2, %vm147_vm1  ;;  %v190_v12 = vand.u32 2147483647, %v180_v50  ;;  %vm186_vm6 = vweird.f32 %v180_v50 }
  0xb9   :  { %v143_v55 = vsub.f32 1.0, %v142_v54  ;;  %v193_v18 = vor.u32 1.1754944e-38, %v192_v7 }
  0xba   :  { %vm191_vm8 = vcmp.eq.f32.partialorder %v190_v12, 8.507059e+37 }
  0xbb   :  { %v144_v59 = vmul.f32 %v348_v51, %v143_v55 }
  0xbd   :  { %v350_v61 = vpop.eup %349  ;;  %v145_v62 = vadd.f32 %v348_v51, %v144_v59 }
  0xbe   :  { %v182_v1 = vmul.f32 %v350_v61, %v180_v50  ;;  %vm187_vm5 = vweird.f32 %v350_v61 }
  0xbf   :  { %v149_v3 = vsel %vm148_vm3, %v348_v51, %v145_v62  ;;  %vm188_vm7 = vmor %vm186_vm6, %vm187_vm5 }
  0xc0   :  { %v154_v4 = vsel %vm151_vm4, %v153_v63, %v149_v3  ;;  %v183_v5 = vsub.f32 1.0, %v182_v1  ;;  %v345_v1 = vld [vmem:[%s576_s4] ss:$0 sm:$0xff]  ;;  %s462_s4 = smov [#allocation8]  }
  0xc1   :  { %v155_v6 = vmul.f32 %v154_v4, %v130_v2  ;;  %s307_s21 = sshll.u32 %s462_s4, 4  ;;  %s308_s21 = int_to_ptr.vmem [resolvable:$true] %s307_s21 }
  0xc2   :  { %v184_v11 = vmul.f32 %v350_v61, %v183_v5 }
  0xc3   :  { %v325_v14 = vclamps-f32 %v155_v6, 1.0 }
  0xc4   :  { %v185_v15 = vadd.f32 %v350_v61, %v184_v11 }
  0xc5   :  { %v198_v19 = vadd.f32 1.0, %v325_v14  ;;  %v346_v14 = vld [vmem:[%s578_s6] ss:$0 sm:$0xff] }
  0xc6   :  { %v189_v20 = vsel %vm188_vm7, %v350_v61, %v185_v15  ;;  %v344_v61 = vld [vmem:[%s575_s3] ss:$0 sm:$0xff] }
  0xc7   :  { %v194_v21 = vsel %vm191_vm8, %v193_v18, %v189_v20  ;;  %v538_v22 = vmul.f32 %v198_v19, %v114_v17 }
  0xc8   :  { %v195_v23 = vmul.f32 %v194_v21, %v170_v9 }
  0xc9   :  { %v202_v24 = vsel %vm84_vm0, %v538_v22, 0.0  ;;  %v210_v8 = vmul.f32 %v538_v22, %v538_v22 }
  0xca   :  { %203 = vadd.xlane.f32.xlu1 %v202_v24  ;;  %v326_v25 = vclamps-f32 %v195_v23, 1.0 }
  0xcb   :  { %v212_v29 = vsel %vm84_vm0, %v210_v8, 0.0 }
  0xcc   :  { %v199_v27 = vadd.f32 1.0, %v326_v25 }
  0xce   :  { %v545_v28 = vmul.f32 %v199_v27, %v115_v26 }
  0xd0   :  { %v205_v16 = vsel %vm84_vm0, %v545_v28, 0.0  ;;  %v211_v30 = vmul.f32 %v545_v28, %v545_v28 }
  0xd1   :  { %206 = vadd.xlane.f32.xlu0 %v205_v16 }
  0xd2   :  { %213 = vadd.xlane.f32.xlu1 %v212_v29  ;;  %v215_v31 = vsel %vm84_vm0, %v211_v30, 0.0 }
  0xd9   :  { %216 = vadd.xlane.f32.xlu0 %v215_v31 }
 0x13d   :  { %v204_v13 = vpop.xlane.xlu1 %203 }
 0x13e   :  { %v208_v33 = vmul.f32 0.03125, %v204_v13 }
 0x140   :  { %v220_v39 = vmul.f32 %v208_v33, %v208_v33  ;;  %v226_v59 = vsub.f32 %v538_v22, %v208_v33 }
 0x144   :  { %v207_v35 = vpop.xlane.xlu0 %206 }
 0x145   :  { %v214_v38 = vpop.xlane.xlu1 %213  ;;  %v209_v42 = vmul.f32 0.03125, %v207_v35 }
 0x146   :  { %v218_v40 = vmul.f32 0.03125, %v214_v38 }
 0x147   :  { %v221_v46 = vmul.f32 %v209_v42, %v209_v42  ;;  %v227_v6 = vsub.f32 %v545_v28, %v209_v42 }
 0x148   :  { %v222_v41 = vsub.f32 %v218_v40, %v220_v39 }
 0x14a   :  { %v224_v43 = vmax.f32 %v222_v41, 0.0 }
 0x14c   :  { %v228_v44 = vadd.f32 1e-12, %v224_v43  ;;  %v217_v45 = vpop.xlane.xlu0 %216 }
 0x14d   :  { %v219_v47 = vmul.f32 0.03125, %v217_v45 }
 0x14e   :  { %351 = vrsqrt.f32 %v228_v44  ;;  %vm236_vm10 = vweird.f32 %v228_v44 }
 0x14f   :  { %v223_v48 = vsub.f32 %v219_v47, %v221_v46 }
 0x151   :  { %v225_v49 = vmax.f32 %v223_v48, 0.0 }
 0x153   :  { %v229_v50 = vadd.f32 1e-12, %v225_v49 }
 0x154   :  { %v352_v51 = vpop.eup %351 }
 0x155   :  { %v231_v52 = vmul.f32 %v352_v51, %v228_v44  ;;  %353 = vrsqrt.f32 %v229_v50  ;;  %vm237_vm9 = vweird.f32 %v352_v51  ;;  %vm246_vm13 = vweird.f32 %v229_v50 }
 0x156   :  { %vm238_vm11 = vmor %vm236_vm10, %vm237_vm9 }
 0x157   :  { %v232_v53 = vmul.f32 %v352_v51, %v231_v52 }
 0x159   :  { %v233_v54 = vmul.f32 0.5, %v232_v53 }
 0x15b   :  { %v354_v55 = vpop.eup %353  ;;  %v234_v56 = vsub.f32 1.5, %v233_v54 }
 0x15c   :  { %v241_v57 = vmul.f32 %v354_v55, %v229_v50  ;;  %vm247_vm12 = vweird.f32 %v354_v55 }
 0x15d   :  { %v235_v58 = vmul.f32 %v352_v51, %v234_v56  ;;  %vm248_vm14 = vmor %vm246_vm13, %vm247_vm12 }
 0x15e   :  { %v242_v60 = vmul.f32 %v354_v55, %v241_v57 }
 0x15f   :  { %v239_v62 = vsel %vm238_vm11, %v352_v51, %v235_v58 }
 0x160   :  { %v243_v63 = vmul.f32 0.5, %v242_v60  ;;  %v250_v0 = vmul.f32 %v239_v62, %v226_v59 }
 0x162   :  { %v244_v2 = vsub.f32 1.5, %v243_v63  ;;  %v256_v3 = vmul.f32 %v344_v61, %v250_v0 }
 0x164   :  { %v245_v4 = vmul.f32 %v354_v55, %v244_v2  ;;  %v262_v5 = vadd.f32 %v345_v1, %v256_v3 }
 0x166   :  { %327 = vmatmul.msk.f32.vlgmr.msra.gmra.mxu1 %vm84_vm0, %v262_v5  ;;  %v249_v7 = vsel %vm248_vm14, %v354_v55, %v245_v4 }
 0x167   :  { %v251_v10 = vmul.f32 %v249_v7, %v227_v6 }
 0x169   :  { %v257_v11 = vmul.f32 %v344_v61, %v251_v10 }
 0x16b   :  { %v263_v12 = vadd.f32 %v345_v1, %v257_v11 }
 0x16d   :  { %328 = vmatmul.msk.f32.vlgmr.msra.gmra.mxu3 %vm84_vm0, %v263_v12 }
 0x1e3   :  { %v295_v15 = vpop.f32.mrf.mxu1 }
 0x1e4   :  { %v296_v17 = vadd.f32 %v346_v14, %v295_v15 }
 0x1e6   :  { %301 = vst [vmem:[#allocation8] sm:$0xff] %v296_v17 }
 0x1f0   :  { %v298_v18 = vpop.f32.mrf.mxu3 }
 0x1f1   :  { %v299_v19 = vadd.f32 %v346_v14, %v298_v18 }
 0x1f3   :  { %302 = vst [vmem:[#allocation8 + $0x8] sm:$0xff] %v299_v19 }
 0x1f4   :  { %315 = dma.vmem_to_hbm [thread:$0]  %s308_s21, 256, %s310_s24, [#allocation4], %s458_s9, %s458_s9, %s459_s10  }
 0x1f5   :  { %455 = dma.done.wait [#allocation4], 256  }
 0x1f6   :  { %456 = vsyncadd [#allocation4], 4294967040 }
 0x1f7   :  { %320 = vsyncpa [#allocation3], 1 }
 0x1f8   :  { %321 = vsyncpa [#allocation6], 1 }
 0x1f9   :  { %322 = vsyncpa [#allocation4], 1 }

// kernel: tpu_custom_call.1
= control target key start
LH: loop header
LB: loop body
LE: loop exit
PB: predicated region body
PF: predicated region fallthrough
CT: control target
= control target key end

     0   :  { %12 = vsyncpa [#allocation3], 0  ;;  %s572_s0 = inlined_call_operand.hbm [shape: f32[16,32], index: 0, kind: input, shape index: {}]   ;;  %s573_s1 = inlined_call_operand.hbm [shape: f32[32,32], index: 1, kind: input, shape index: {}]   ;;  %s574_s2 = inlined_call_operand.vmem [shape: f32[1,32], index: 2, kind: input, shape index: {}]   ;;  %s575_s3 = inlined_call_operand.vmem [shape: f32[1,32], index: 3, kind: input, shape index: {}]   ;;  %s576_s4 = inlined_call_operand.vmem [shape: f32[1,32], index: 4, kind: input, shape index: {}]   ;;  %s577_s5 = inlined_call_operand.hbm [shape: f32[32,128], index: 5, kind: input, shape index: {}]   ;;  %s578_s6 = inlined_call_operand.vmem [shape: f32[1,128], index: 6, kind: input, shape index: {}]   ;;  %s579_s7 = inlined_call_operand.hbm [shape: f32[16,128], index: 7, kind: output, shape index: {}]  }
   0x1   :  { %13 = vsyncpa [#allocation6], 0 }
   0x2   :  { %14 = vsyncpa [#allocation4], 0  ;;  %s32_s26 = sshll.u32 %s573_s1, 4  ;;  %s457_s27 = smov [#allocation5]   ;;  %s33_s26 = int_to_ptr.hbm [resolvable:$true] %s32_s26 }
   0x3   :  { %s34_s28 = sshll.u32 %s457_s27, 4  ;;  %s19_s8 = sshll.u32 %s572_s0, 4  ;;  %s35_s28 = int_to_ptr.vmem [resolvable:$true] %s34_s28  ;;  %s20_s8 = int_to_ptr.hbm [resolvable:$true] %s19_s8 }
   0x4   :  { %s458_s9 = smov 128   ;;  %s459_s10 = smov 8  }
   0x5   :  { %40 = dma.hbm_to_vmem [thread:$0]  %s33_s26, 512, %s35_s28, [#allocation6], %s458_s9, %s458_s9, %s459_s10  }
   0x6   :  { %s460_s11 = smov [#allocation2]   ;;  %s51_s1 = sshll.u32 %s577_s5, 4  ;;  %s52_s1 = int_to_ptr.hbm [resolvable:$true] %s51_s1 }
   0x7   :  { %s21_s12 = sshll.u32 %s460_s11, 4  ;;  %s461_s0 = smov [#allocation7]   ;;  %s22_s12 = int_to_ptr.vmem [resolvable:$true] %s21_s12 }
   0x8   :  { %27 = dma.hbm_to_vmem [thread:$0]  %s20_s8, 256, %s22_s12, [#allocation3], %s458_s9, %s458_s9, %s459_s10  }
   0x9   :  { %s53_s15 = sshll.u32 %s461_s0, 4  ;;  %s54_s15 = int_to_ptr.vmem [resolvable:$true] %s53_s15 }
   0xa   :  { %59 = dma.hbm_to_vmem [thread:$0]  %s52_s1, 512, %s54_s15, [#allocation6], %s458_s9, %s458_s9, %s459_s10  }
   0xb   :  { %451 = dma.done.wait [#allocation3], 256  }
   0xc   :  { %452 = vsyncadd [#allocation3], 4294967040 }
   0xd   :  { %453 = dma.done.wait [#allocation6], 1024  }
   0xe   :  { %454 = vsyncadd [#allocation6], 4294966272  ;;  %v79_v0 = vld [vmem:[#allocation5 + $0x18] sm:$0xff]  ;;  %v78_v1 = vld [vmem:[#allocation5 + $0x10] sm:$0xff]  ;;  %vm84_vm0 = vcmask 261120   ;;  %s309_s24 = sshll.u32 %s579_s7, 4  ;;  %s310_s24 = int_to_ptr.hbm [resolvable:$true] %s309_s24 }
   0xf   :  { %103 = vmatpush.msra.mxu0 %v79_v0  ;;  %329 = vmatpush.msra.mxu2 %v79_v0  ;;  %v77_v2 = vld [vmem:[#allocation5 + $0x8] sm:$0xff]  ;;  %v76_v3 = vld [vmem:[#allocation5] sm:$0xff]  ;;  %v74_v4 = vld [vmem:[#allocation2] sm:$0xff] }
  0x10   :  { %v75_v5 = vld [vmem:[#allocation2 + $0x8] sm:$0xff]  ;;  %v343_v6 = vld [vmem:[%s574_s2] ss:$0 sm:$0xff] }
  0x11   :  { %104 = vmatpush.msra.mxu0 %v78_v1  ;;  %330 = vmatpush.msra.mxu2 %v78_v1 }
  0x13   :  { %105 = vmatpush.msra.mxu0 %v77_v2  ;;  %331 = vmatpush.msra.mxu2 %v77_v2 }
  0x15   :  { %106 = vmatpush.msra.mxu0 %v76_v3  ;;  %332 = vmatpush.msra.mxu2 %v76_v3 }
  0x16   :  { %323 = vmatmul.msk.f32.vlgmr.msra.gmra.mxu0 %vm84_vm0, %v74_v4  ;;  %324 = vmatmul.msk.f32.vlgmr.msra.gmra.mxu2 %vm84_vm0, %v75_v5 }
  0x93   :  { %v108_v7 = vpop.f32.mrf.mxu0 }
  0x94   :  { %v526_v8 = vadd.f32 %v343_v6, %v108_v7 }
  0x96   :  { %v116_v9 = vmul.f32 0.70710677, %v526_v8 }
  0x98   :  { %v118_v10 = vmul.f32 %v116_v9, %v116_v9 }
  0x99   :  { %v111_v11 = vpop.f32.mrf.mxu2 }
  0x9a   :  { %v119_v12 = vmin.f32 %v118_v10, 16.0  ;;  %v529_v13 = vadd.f32 %v343_v6, %v111_v11 }
  0x9c   :  { %v120_v14 = vmul.f32 2.1237322e-06, %v119_v12  ;;  %v131_v15 = vmul.f32 3.8918573e-05, %v119_v12  ;;  %v532_v16 = vmul.f32 0.70710677, %v529_v13 }
  0x9e   :  { %v121_v17 = vadd.f32 0.00028619796, %v120_v14  ;;  %v132_v18 = vadd.f32 0.001143296, %v131_v15  ;;  %v158_v19 = vmul.f32 %v532_v16, %v532_v16 }
  0xa0   :  { %v122_v20 = vmul.f32 %v121_v17, %v119_v12  ;;  %v133_v21 = vmul.f32 %v132_v18, %v119_v12  ;;  %v159_v22 = vmin.f32 %v158_v19, 16.0  ;;  %v114_v17 = vmul.f32 0.5, %v526_v8 }
  0xa2   :  { %v134_v23 = vadd.f32 0.014752088, %v133_v21  ;;  %v123_v24 = vadd.f32 0.0036580483, %v122_v20  ;;  %v160_v25 = vmul.f32 2.1237322e-06, %v159_v22 }
  0xa3   :  { %v171_v26 = vmul.f32 3.8918573e-05, %v159_v22 }
  0xa4   :  { %v135_v27 = vmul.f32 %v134_v23, %v119_v12  ;;  %v161_v28 = vadd.f32 0.00028619796, %v160_v25  ;;  %v124_v31 = vmul.f32 %v123_v24, %v119_v12 }
  0xa5   :  { %v172_v29 = vadd.f32 0.001143296, %v171_v26  ;;  %v115_v26 = vmul.f32 0.5, %v529_v13 }
  0xa6   :  { %v136_v30 = vadd.f32 0.112945676, %v135_v27  ;;  %v162_v32 = vmul.f32 %v161_v28, %v159_v22  ;;  %v125_v38 = vadd.f32 0.05243302, %v124_v31 }
  0xa7   :  { %v173_v33 = vmul.f32 %v172_v29, %v159_v22 }
  0xa8   :  { %v137_v34 = vmul.f32 %v136_v30, %v119_v12  ;;  %v163_v37 = vadd.f32 0.0036580483, %v162_v32  ;;  %v126_v44 = vmul.f32 %v125_v38, %v119_v12  ;;  %v267_v32 = vld [vmem:[#allocation7 + $0x18] sm:$0xff] }
  0xa9   :  { %v174_v35 = vadd.f32 0.014752088, %v173_v33  ;;  %290 = vmatpush.msra.mxu1 %v267_v32  ;;  %333 = vmatpush.msra.mxu3 %v267_v32 }
  0xaa   :  { %v138_v36 = vadd.f32 0.4994258, %v137_v34  ;;  %v164_v43 = vmul.f32 %v163_v37, %v159_v22  ;;  %v127_v48 = vadd.f32 0.18741608, %v126_v44  ;;  %v266_v34 = vld [vmem:[#allocation7 + $0x10] sm:$0xff]  ;;  %v264_v37 = vld [vmem:[#allocation7] sm:$0xff] }
  0xab   :  { %v175_v39 = vmul.f32 %v174_v35, %v159_v22  ;;  %291 = vmatpush.msra.mxu1 %v266_v34  ;;  %334 = vmatpush.msra.mxu3 %v266_v34 }
  0xac   :  { %v139_v40 = vmul.f32 %v138_v36, %v119_v12  ;;  %v165_v47 = vadd.f32 0.05243302, %v164_v43  ;;  %v128_v53 = vmul.f32 %v127_v48, %v119_v12  ;;  %v265_v36 = vld [vmem:[#allocation7 + $0x8] sm:$0xff] }
  0xad   :  { %v176_v41 = vadd.f32 0.112945676, %v175_v39  ;;  %292 = vmatpush.msra.mxu1 %v265_v36  ;;  %335 = vmatpush.msra.mxu3 %v265_v36 }
  0xae   :  { %v140_v42 = vadd.f32 1.0, %v139_v40  ;;  %v166_v52 = vmul.f32 %v165_v47, %v159_v22  ;;  %v129_v58 = vadd.f32 1.1283791, %v128_v53 }
  0xaf   :  { %v177_v45 = vmul.f32 %v176_v41, %v159_v22  ;;  %293 = vmatpush.msra.mxu1 %v264_v37  ;;  %336 = vmatpush.msra.mxu3 %v264_v37 }
  0xb0   :  { %347 = vrcp.f32 %v140_v42  ;;  %v152_v56 = vand.u32 2147483648, %v140_v42  ;;  %v167_v57 = vadd.f32 0.18741608, %v166_v52  ;;  %v150_v60 = vand.u32 2147483647, %v140_v42 }
  0xb1   :  { %v178_v46 = vadd.f32 0.4994258, %v177_v45  ;;  %vm146_vm2 = vweird.f32 %v140_v42  ;;  %v130_v2 = vmul.f32 %v129_v58, %v116_v9 }
  0xb2   :  { %v153_v63 = vor.u32 1.1754944e-38, %v152_v56  ;;  %v168_v0 = vmul.f32 %v167_v57, %v159_v22  ;;  %vm151_vm4 = vcmp.eq.f32.partialorder %v150_v60, 8.507059e+37 }
  0xb3   :  { %v179_v49 = vmul.f32 %v178_v46, %v159_v22 }
  0xb4   :  { %v169_v10 = vadd.f32 1.1283791, %v168_v0 }
  0xb5   :  { %v180_v50 = vadd.f32 1.0, %v179_v49 }
  0xb6   :  { %v348_v51 = vpop.eup %347  ;;  %v170_v9 = vmul.f32 %v169_v10, %v532_v16 }
  0xb7   :  { %v142_v54 = vmul.f32 %v348_v51, %v140_v42  ;;  %349 = vrcp.f32 %v180_v50  ;;  %vm147_vm1 = vweird.f32 %v348_v51  ;;  %v192_v7 = vand.u32 2147483648, %v180_v50 }
  0xb8   :  { %vm148_vm3 = vmor %vm146_vm2, %vm147_vm1  ;;  %v190_v12 = vand.u32 2147483647, %v180_v50  ;;  %vm186_vm6 = vweird.f32 %v180_v50 }
  0xb9   :  { %v143_v55 = vsub.f32 1.0, %v142_v54  ;;  %v193_v18 = vor.u32 1.1754944e-38, %v192_v7 }
  0xba   :  { %vm191_vm8 = vcmp.eq.f32.partialorder %v190_v12, 8.507059e+37 }
  0xbb   :  { %v144_v59 = vmul.f32 %v348_v51, %v143_v55 }
  0xbd   :  { %v350_v61 = vpop.eup %349  ;;  %v145_v62 = vadd.f32 %v348_v51, %v144_v59 }
  0xbe   :  { %v182_v1 = vmul.f32 %v350_v61, %v180_v50  ;;  %vm187_vm5 = vweird.f32 %v350_v61 }
  0xbf   :  { %v149_v3 = vsel %vm148_vm3, %v348_v51, %v145_v62  ;;  %vm188_vm7 = vmor %vm186_vm6, %vm187_vm5 }
  0xc0   :  { %v154_v4 = vsel %vm151_vm4, %v153_v63, %v149_v3  ;;  %v183_v5 = vsub.f32 1.0, %v182_v1  ;;  %v345_v1 = vld [vmem:[%s576_s4] ss:$0 sm:$0xff]  ;;  %s462_s4 = smov [#allocation8]  }
  0xc1   :  { %v155_v6 = vmul.f32 %v154_v4, %v130_v2  ;;  %s307_s21 = sshll.u32 %s462_s4, 4  ;;  %s308_s21 = int_to_ptr.vmem [resolvable:$true] %s307_s21 }
  0xc2   :  { %v184_v11 = vmul.f32 %v350_v61, %v183_v5 }
  0xc3   :  { %v325_v14 = vclamps-f32 %v155_v6, 1.0 }
  0xc4   :  { %v185_v15 = vadd.f32 %v350_v61, %v184_v11 }
  0xc5   :  { %v198_v19 = vadd.f32 1.0, %v325_v14  ;;  %v346_v14 = vld [vmem:[%s578_s6] ss:$0 sm:$0xff] }
  0xc6   :  { %v189_v20 = vsel %vm188_vm7, %v350_v61, %v185_v15  ;;  %v344_v61 = vld [vmem:[%s575_s3] ss:$0 sm:$0xff] }
  0xc7   :  { %v194_v21 = vsel %vm191_vm8, %v193_v18, %v189_v20  ;;  %v538_v22 = vmul.f32 %v198_v19, %v114_v17 }
  0xc8   :  { %v195_v23 = vmul.f32 %v194_v21, %v170_v9 }
  0xc9   :  { %v202_v24 = vsel %vm84_vm0, %v538_v22, 0.0  ;;  %v210_v8 = vmul.f32 %v538_v22, %v538_v22 }
  0xca   :  { %203 = vadd.xlane.f32.xlu1 %v202_v24  ;;  %v326_v25 = vclamps-f32 %v195_v23, 1.0 }
  0xcb   :  { %v212_v29 = vsel %vm84_vm0, %v210_v8, 0.0 }
  0xcc   :  { %v199_v27 = vadd.f32 1.0, %v326_v25 }
  0xce   :  { %v545_v28 = vmul.f32 %v199_v27, %v115_v26 }
  0xd0   :  { %v205_v16 = vsel %vm84_vm0, %v545_v28, 0.0  ;;  %v211_v30 = vmul.f32 %v545_v28, %v545_v28 }
  0xd1   :  { %206 = vadd.xlane.f32.xlu0 %v205_v16 }
  0xd2   :  { %213 = vadd.xlane.f32.xlu1 %v212_v29  ;;  %v215_v31 = vsel %vm84_vm0, %v211_v30, 0.0 }
  0xd9   :  { %216 = vadd.xlane.f32.xlu0 %v215_v31 }
 0x13d   :  { %v204_v13 = vpop.xlane.xlu1 %203 }
 0x13e   :  { %v208_v33 = vmul.f32 0.03125, %v204_v13 }
 0x140   :  { %v220_v39 = vmul.f32 %v208_v33, %v208_v33  ;;  %v226_v59 = vsub.f32 %v538_v22, %v208_v33 }
 0x144   :  { %v207_v35 = vpop.xlane.xlu0 %206 }
 0x145   :  { %v214_v38 = vpop.xlane.xlu1 %213  ;;  %v209_v42 = vmul.f32 0.03125, %v207_v35 }
 0x146   :  { %v218_v40 = vmul.f32 0.03125, %v214_v38 }
 0x147   :  { %v221_v46 = vmul.f32 %v209_v42, %v209_v42  ;;  %v227_v6 = vsub.f32 %v545_v28, %v209_v42 }
 0x148   :  { %v222_v41 = vsub.f32 %v218_v40, %v220_v39 }
 0x14a   :  { %v224_v43 = vmax.f32 %v222_v41, 0.0 }
 0x14c   :  { %v228_v44 = vadd.f32 1e-12, %v224_v43  ;;  %v217_v45 = vpop.xlane.xlu0 %216 }
 0x14d   :  { %v219_v47 = vmul.f32 0.03125, %v217_v45 }
 0x14e   :  { %351 = vrsqrt.f32 %v228_v44  ;;  %vm236_vm10 = vweird.f32 %v228_v44 }
 0x14f   :  { %v223_v48 = vsub.f32 %v219_v47, %v221_v46 }
 0x151   :  { %v225_v49 = vmax.f32 %v223_v48, 0.0 }
 0x153   :  { %v229_v50 = vadd.f32 1e-12, %v225_v49 }
 0x154   :  { %v352_v51 = vpop.eup %351 }
 0x155   :  { %v231_v52 = vmul.f32 %v352_v51, %v228_v44  ;;  %353 = vrsqrt.f32 %v229_v50  ;;  %vm237_vm9 = vweird.f32 %v352_v51  ;;  %vm246_vm13 = vweird.f32 %v229_v50 }
 0x156   :  { %vm238_vm11 = vmor %vm236_vm10, %vm237_vm9 }
 0x157   :  { %v232_v53 = vmul.f32 %v352_v51, %v231_v52 }
 0x159   :  { %v233_v54 = vmul.f32 0.5, %v232_v53 }
 0x15b   :  { %v354_v55 = vpop.eup %353  ;;  %v234_v56 = vsub.f32 1.5, %v233_v54 }
 0x15c   :  { %v241_v57 = vmul.f32 %v354_v55, %v229_v50  ;;  %vm247_vm12 = vweird.f32 %v354_v55 }
 0x15d   :  { %v235_v58 = vmul.f32 %v352_v51, %v234_v56  ;;  %vm248_vm14 = vmor %vm246_vm13, %vm247_vm12 }
 0x15e   :  { %v242_v60 = vmul.f32 %v354_v55, %v241_v57 }
 0x15f   :  { %v239_v62 = vsel %vm238_vm11, %v352_v51, %v235_v58 }
 0x160   :  { %v243_v63 = vmul.f32 0.5, %v242_v60  ;;  %v250_v0 = vmul.f32 %v239_v62, %v226_v59 }
 0x162   :  { %v244_v2 = vsub.f32 1.5, %v243_v63  ;;  %v256_v3 = vmul.f32 %v344_v61, %v250_v0 }
 0x164   :  { %v245_v4 = vmul.f32 %v354_v55, %v244_v2  ;;  %v262_v5 = vadd.f32 %v345_v1, %v256_v3 }
 0x166   :  { %327 = vmatmul.msk.f32.vlgmr.msra.gmra.mxu1 %vm84_vm0, %v262_v5  ;;  %v249_v7 = vsel %vm248_vm14, %v354_v55, %v245_v4 }
 0x167   :  { %v251_v10 = vmul.f32 %v249_v7, %v227_v6 }
 0x169   :  { %v257_v11 = vmul.f32 %v344_v61, %v251_v10 }
 0x16b   :  { %v263_v12 = vadd.f32 %v345_v1, %v257_v11 }
 0x16d   :  { %328 = vmatmul.msk.f32.vlgmr.msra.gmra.mxu3 %vm84_vm0, %v263_v12 }
 0x1e3   :  { %v295_v15 = vpop.f32.mrf.mxu1 }
 0x1e4   :  { %v296_v17 = vadd.f32 %v346_v14, %v295_v15 }
 0x1e6   :  { %301 = vst [vmem:[#allocation8] sm:$0xff] %v296_v17 }
 0x1f0   :  { %v298_v18 = vpop.f32.mrf.mxu3 }
 0x1f1   :  { %v299_v19 = vadd.f32 %v346_v14, %v298_v18 }
 0x1f3   :  { %302 = vst [vmem:[#allocation8 + $0x8] sm:$0xff] %v299_v19 }
 0x1f4   :  { %315 = dma.vmem_to_hbm [thread:$0]  %s308_s21, 256, %s310_s24, [#allocation4], %s458_s9, %s458_s9, %s459_s10  }
 0x1f5   :  { %455 = dma.done.wait [#allocation4], 256  }
 0x1f6   :  { %456 = vsyncadd [#allocation4], 4294967040 }
 0x1f7   :  { %320 = vsyncpa [#allocation3], 1 }
 0x1f8   :  { %321 = vsyncpa [#allocation6], 1 }
 0x1f9   :  { %322 = vsyncpa [#allocation4], 1 }

</bundles_post_ra>
